<compile_context>
chip_gen: v6e
topology: v6e:2x2x1
jax: 0.10.0
libtpu: 0.0.40
codegen_flags: <defaults>
</compile_context>

<pallas_src>
import jax
import jax.numpy as jnp
from jax.experimental import pallas as pl
from jax.experimental.pallas import tpu as pltpu


def _round_up(v, m):
    return ((v + m - 1) // m) * m


def gated_proto_kernel(x_ref, ctx_ref, proto_ref, w2_ref, out_ref):
    """One batch tile, native batch-major layout.

    x_ref    : (TB, I)    any float dtype (cast in-VMEM to the matmul dtype)
    ctx_ref  : (TB, C)    any float dtype (gating math always f32)
    proto_ref: (P, C)     f32, resident
    w2_ref   : (I, P*N)   matmul dtype, resident; w2[i, p*N + n] = weights[p, n, i]
    out_ref  : (TB, N)    f32
    """
    ctx = ctx_ref[...].astype(jnp.float32)                    # (TB, C)
    protos = proto_ref[...].astype(jnp.float32)               # (P, C)
    num_protos = protos.shape[0]
    n_neuron = w2_ref.shape[1] // num_protos

    # --- gate[b] = argmin_p ||ctx[b] - proto[p]||^2 ; exact f32, first-min tie-break ---
    # P and C are tiny (4, 16): a static VPU loop is cheap, avoids an extra MXU dot,
    # and keeps the gate bit-identical to the reference argmin.
    diff = ctx - protos[0:1, :]
    best = jnp.sum(diff * diff, axis=1, keepdims=True)        # (TB, 1)
    gate = jnp.zeros(best.shape, jnp.int32)                   # (TB, 1)
    for p_idx in range(1, num_protos):
        diff = ctx - protos[p_idx:p_idx + 1, :]
        d = jnp.sum(diff * diff, axis=1, keepdims=True)
        take = d < best                                        # strict < -> keep first min
        best = jnp.where(take, d, best)
        gate = jnp.where(take, p_idx, gate)

    # --- single fused matmul over all prototypes: (TB, I) @ (I, P*N), f32 accumulation ---
    x = x_ref[...].astype(w2_ref.dtype)
    s = jnp.dot(x, w2_ref[...], preferred_element_type=jnp.float32)   # (TB, P*N)

    # --- select the chosen prototype's N columns (P cheap masked adds) ---
    h = jnp.where(gate == 0, s[:, 0:n_neuron], 0.0)
    for p_idx in range(1, num_protos):
        h = h + jnp.where(gate == p_idx,
                          s[:, p_idx * n_neuron:(p_idx + 1) * n_neuron], 0.0)

    out_ref[...] = h.astype(out_ref.dtype)


def mr_class_layer_forward(x, context, prototypes, weights, *,
                           tile_b=None, matmul_dtype=jnp.bfloat16):
    """MR_ClassLayer.forward(X, context) -> h, via a Pallas TPU kernel.

    x          : (B, I) float      context : (B, C) float
    prototypes : (P, C) float      weights : (P, N, I) float
    returns h  : (B, N) float32
    """
    B, I = x.shape
    C = context.shape[1]
    P, N, I_w = weights.shape
    assert I_w == I and prototypes.shape == (P, C)

    if tile_b is None:
        if B <= 128:
            tile_b = _round_up(B, 8)                           # one small block
        else:
            # target >= ~8 grid steps (megacore sharding + pipelining), capped tile size
            tile_b = min(4096, _round_up(pl.cdiv(B, 8), 128))
    assert tile_b % 8 == 0
    num_tiles = pl.cdiv(B, tile_b)                             # ragged last block is fine

    protos = prototypes.astype(jnp.float32)                    # (P, C) tiny, resident
    # w2[i, p*N + n] = weights[p, n, i]   (tiny, resident in VMEM)
    w2 = jnp.transpose(weights, (2, 0, 1)).reshape(I, P * N).astype(matmul_dtype)

    cost = pl.CostEstimate(
        flops=2 * B * I * P * N + 3 * B * C * P,
        transcendentals=0,
        bytes_accessed=(x.size * x.dtype.itemsize
                        + context.size * context.dtype.itemsize
                        + protos.size * 4
                        + w2.size * w2.dtype.itemsize
                        + B * N * 4),
    )

    return pl.pallas_call(
        gated_proto_kernel,
        out_shape=jax.ShapeDtypeStruct((B, N), jnp.float32),
        grid_spec=pltpu.PrefetchScalarGridSpec(
            num_scalar_prefetch=0,
            grid=(num_tiles,),
            in_specs=[
                pl.BlockSpec((tile_b, I), lambda i: (i, 0)),    # X tile (contiguous rows)
                pl.BlockSpec((tile_b, C), lambda i: (i, 0)),    # context tile
                pl.BlockSpec((P, C), lambda i: (0, 0)),         # prototypes (resident)
                pl.BlockSpec((I, P * N), lambda i: (0, 0)),     # fused gated weights (resident)
            ],
            out_specs=pl.BlockSpec((tile_b, N), lambda i: (i, 0)),
        ),
        compiler_params=pltpu.CompilerParams(
            dimension_semantics=("parallel",),   # batch tiles shard across v7x's 2 TCs
        ),
        cost_estimate=cost,
    )(x, context, protos, w2)


def reference_forward(x, context, prototypes, weights):
    """Pure-JAX reference for correctness checking."""
    d = jnp.sum((context[:, None, :] - prototypes[None, :, :]) ** 2, axis=-1)  # (B, P)
    gate = jnp.argmin(d, axis=-1)                                              # (B,)
    w_sel = weights[gate]                                                      # (B, N, I)
    return jnp.einsum("bi,bni->bn", x, w_sel)


if __name__ == "__main__":
    # Module hyper-parameters (consistent with __init__ signature):
    in_channels = 32      # in_features of LinearGatedProto
    n_neuron = 16         # out_features
    context_dim = 16
    n_prototypes = 4
    batch = 256

    key = jax.random.PRNGKey(0)
    kx, kc, kp, kw = jax.random.split(key, 4)

    x = jax.random.normal(kx, (batch, in_channels), dtype=jnp.float32)
    context = jax.random.normal(kc, (batch, context_dim), dtype=jnp.float32)
    # set_prototypes(training_set[prototype_indices]) -> deterministic synthetic prototypes
    prototypes = jax.random.normal(kp, (n_prototypes, context_dim), dtype=jnp.float32)
    # reset_parameters(): deterministic synthetic weight init (GLN-style small uniform)
    weights = jax.random.uniform(
        kw, (n_prototypes, n_neuron, in_channels),
        minval=-1.0 / in_channels, maxval=1.0 / in_channels, dtype=jnp.float32)

    # 1) f32 matmul path, batch divisible by the tile.
    h = jax.block_until_ready(
        mr_class_layer_forward(x, context, prototypes, weights, matmul_dtype=jnp.float32))
    h_ref = reference_forward(x, context, prototypes, weights)
    assert h.shape == (batch, n_neuron)
    assert jnp.allclose(h, h_ref, atol=1e-4, rtol=1e-4), "f32 mismatch vs reference"

    # 2) default (bf16 matmul) path + batch NOT divisible by the tile (ragged last block).
    b2 = 200
    h2 = jax.block_until_ready(
        mr_class_layer_forward(x[:b2], context[:b2], prototypes, weights))
    h2_ref = reference_forward(x[:b2], context[:b2], prototypes, weights)
    assert h2.shape == (b2, n_neuron)
    assert jnp.allclose(h2, h2_ref, atol=1e-2, rtol=1e-2), "bf16 mismatch vs reference"

    # 3) caller-side bf16 activations (halves the dominant HBM stream); context kept f32
    #    so the gating stays exact.
    x_bf16 = x[:b2].astype(jnp.bfloat16)
    h3 = jax.block_until_ready(
        mr_class_layer_forward(x_bf16, context[:b2], prototypes, weights))
    assert h3.shape == (b2, n_neuron)
    assert jnp.allclose(h3, h2_ref, atol=1e-2, rtol=1e-2), "bf16-input mismatch vs reference"

    print("KERNEL_OK")
</pallas_src>

<mosaic_0001>
module attributes {stable_mosaic.version = 11 : i64} {
  func.func @gated_proto_kernel(%arg0: i32, %arg1: memref<128x32xf32, #tpu.memory_space<vmem>>, %arg2: memref<128x16xf32, #tpu.memory_space<vmem>>, %arg3: memref<4x16xf32, #tpu.memory_space<vmem>>, %arg4: memref<32x64xf32, #tpu.memory_space<vmem>>, %arg5: memref<128x16xf32, #tpu.memory_space<vmem>>) attributes {dimension_semantics = [#tpu.dimension_semantics<parallel>], iteration_bounds = array<i64: 2>, scalar_prefetch = 0 : i64, scratch_operands = 0 : i64, tpu.core_type = #tpu.core_type<tc>, window_params = [{transform_indices = @transform_0, window_bounds = array<i64: 128, 32>}, {transform_indices = @transform_1, window_bounds = array<i64: 128, 16>}, {pipeline_mode = #tpu.pipeline_mode<synchronous>, transform_indices = @transform_2, window_bounds = array<i64: 4, 16>}, {pipeline_mode = #tpu.pipeline_mode<synchronous>, transform_indices = @transform_3, window_bounds = array<i64: 32, 64>}, {transform_indices = @transform_4, window_bounds = array<i64: 128, 16>}]} {
    %c0 = arith.constant 0 : index
    %c0_0 = arith.constant 0 : index
    %0 = vector.load %arg2[%c0, %c0_0] : memref<128x16xf32, #tpu.memory_space<vmem>>, vector<128x16xf32>
    %c0_1 = arith.constant 0 : index
    %c0_2 = arith.constant 0 : index
    %1 = vector.load %arg3[%c0_1, %c0_2] : memref<4x16xf32, #tpu.memory_space<vmem>>, vector<4x16xf32>
    %2 = vector.extract_strided_slice %1 {offsets = [0, 0], sizes = [1, 16], strides = [1, 1]} : vector<4x16xf32> to vector<1x16xf32>
    %3 = vector.broadcast %2 : vector<1x16xf32> to vector<128x16xf32>
    %4 = arith.subf %0, %3 : vector<128x16xf32>
    %5 = arith.mulf %4, %4 : vector<128x16xf32>
    %cst = arith.constant dense<0.000000e+00> : vector<128xf32>
    %6 = vector.multi_reduction <add>, %5, %cst [1] : vector<128x16xf32> to vector<128xf32>
    %7 = vector.shape_cast %6 : vector<128xf32> to vector<128x1xf32>
    %c0_i32 = arith.constant 0 : i32
    %8 = vector.broadcast %c0_i32 : i32 to vector<128x1xi32>
    %9 = vector.extract_strided_slice %1 {offsets = [1, 0], sizes = [1, 16], strides = [1, 1]} : vector<4x16xf32> to vector<1x16xf32>
    %10 = vector.broadcast %9 : vector<1x16xf32> to vector<128x16xf32>
    %11 = arith.subf %0, %10 : vector<128x16xf32>
    %12 = arith.mulf %11, %11 : vector<128x16xf32>
    %cst_3 = arith.constant dense<0.000000e+00> : vector<128xf32>
    %13 = vector.multi_reduction <add>, %12, %cst_3 [1] : vector<128x16xf32> to vector<128xf32>
    %14 = vector.shape_cast %13 : vector<128xf32> to vector<128x1xf32>
    %15 = arith.cmpf olt, %14, %7 : vector<128x1xf32>
    %16 = arith.select %15, %14, %7 : vector<128x1xi1>, vector<128x1xf32>
    %c1_i32 = arith.constant 1 : i32
    %17 = vector.broadcast %c1_i32 : i32 to vector<128x1xi32>
    %18 = arith.select %15, %17, %8 : vector<128x1xi1>, vector<128x1xi32>
    %19 = vector.extract_strided_slice %1 {offsets = [2, 0], sizes = [1, 16], strides = [1, 1]} : vector<4x16xf32> to vector<1x16xf32>
    %20 = vector.broadcast %19 : vector<1x16xf32> to vector<128x16xf32>
    %21 = arith.subf %0, %20 : vector<128x16xf32>
    %22 = arith.mulf %21, %21 : vector<128x16xf32>
    %cst_4 = arith.constant dense<0.000000e+00> : vector<128xf32>
    %23 = vector.multi_reduction <add>, %22, %cst_4 [1] : vector<128x16xf32> to vector<128xf32>
    %24 = vector.shape_cast %23 : vector<128xf32> to vector<128x1xf32>
    %25 = arith.cmpf olt, %24, %16 : vector<128x1xf32>
    %26 = arith.select %25, %24, %16 : vector<128x1xi1>, vector<128x1xf32>
    %c2_i32 = arith.constant 2 : i32
    %27 = vector.broadcast %c2_i32 : i32 to vector<128x1xi32>
    %28 = arith.select %25, %27, %18 : vector<128x1xi1>, vector<128x1xi32>
    %29 = vector.extract_strided_slice %1 {offsets = [3, 0], sizes = [1, 16], strides = [1, 1]} : vector<4x16xf32> to vector<1x16xf32>
    %30 = vector.broadcast %29 : vector<1x16xf32> to vector<128x16xf32>
    %31 = arith.subf %0, %30 : vector<128x16xf32>
    %32 = arith.mulf %31, %31 : vector<128x16xf32>
    %cst_5 = arith.constant dense<0.000000e+00> : vector<128xf32>
    %33 = vector.multi_reduction <add>, %32, %cst_5 [1] : vector<128x16xf32> to vector<128xf32>
    %34 = vector.shape_cast %33 : vector<128xf32> to vector<128x1xf32>
    %35 = arith.cmpf olt, %34, %26 : vector<128x1xf32>
    %c3_i32 = arith.constant 3 : i32
    %36 = vector.broadcast %c3_i32 : i32 to vector<128x1xi32>
    %37 = arith.select %35, %36, %28 : vector<128x1xi1>, vector<128x1xi32>
    %c0_6 = arith.constant 0 : index
    %c0_7 = arith.constant 0 : index
    %38 = vector.load %arg1[%c0_6, %c0_7] : memref<128x32xf32, #tpu.memory_space<vmem>>, vector<128x32xf32>
    %c0_8 = arith.constant 0 : index
    %c0_9 = arith.constant 0 : index
    %39 = vector.load %arg4[%c0_8, %c0_9] : memref<32x64xf32, #tpu.memory_space<vmem>>, vector<32x64xf32>
    %cst_10 = arith.constant dense<0.000000e+00> : vector<128x64xf32>
    %40 = tpu.matmul %38, %39, %cst_10 {dimension_numbers = #tpu.dot_dimension_numbers<[1], [0], [0], [1], [0, 0, 1, 1], [], []>} : vector<128x32xf32>, vector<32x64xf32>, vector<128x64xf32> -> vector<128x64xf32>
    %c0_i32_11 = arith.constant 0 : i32
    %41 = vector.broadcast %c0_i32_11 : i32 to vector<128x1xi32>
    %42 = arith.cmpi eq, %37, %41 : vector<128x1xi32>
    %43 = vector.extract_strided_slice %40 {offsets = [0, 0], sizes = [128, 16], strides = [1, 1]} : vector<128x64xf32> to vector<128x16xf32>
    %cst_12 = arith.constant 0.000000e+00 : f32
    %44 = vector.shape_cast %42 : vector<128x1xi1> to vector<128x1xi1>
    %45 = vector.broadcast %44 : vector<128x1xi1> to vector<128x16xi1>
    %46 = vector.broadcast %cst_12 : f32 to vector<128x16xf32>
    %47 = arith.select %45, %43, %46 : vector<128x16xi1>, vector<128x16xf32>
    %c1_i32_13 = arith.constant 1 : i32
    %48 = vector.broadcast %c1_i32_13 : i32 to vector<128x1xi32>
    %49 = arith.cmpi eq, %37, %48 : vector<128x1xi32>
    %50 = vector.extract_strided_slice %40 {offsets = [0, 16], sizes = [128, 16], strides = [1, 1]} : vector<128x64xf32> to vector<128x16xf32>
    %cst_14 = arith.constant 0.000000e+00 : f32
    %51 = vector.shape_cast %49 : vector<128x1xi1> to vector<128x1xi1>
    %52 = vector.broadcast %51 : vector<128x1xi1> to vector<128x16xi1>
    %53 = vector.broadcast %cst_14 : f32 to vector<128x16xf32>
    %54 = arith.select %52, %50, %53 : vector<128x16xi1>, vector<128x16xf32>
    %55 = arith.addf %47, %54 : vector<128x16xf32>
    %c2_i32_15 = arith.constant 2 : i32
    %56 = vector.broadcast %c2_i32_15 : i32 to vector<128x1xi32>
    %57 = arith.cmpi eq, %37, %56 : vector<128x1xi32>
    %58 = vector.extract_strided_slice %40 {offsets = [0, 32], sizes = [128, 16], strides = [1, 1]} : vector<128x64xf32> to vector<128x16xf32>
    %cst_16 = arith.constant 0.000000e+00 : f32
    %59 = vector.shape_cast %57 : vector<128x1xi1> to vector<128x1xi1>
    %60 = vector.broadcast %59 : vector<128x1xi1> to vector<128x16xi1>
    %61 = vector.broadcast %cst_16 : f32 to vector<128x16xf32>
    %62 = arith.select %60, %58, %61 : vector<128x16xi1>, vector<128x16xf32>
    %63 = arith.addf %55, %62 : vector<128x16xf32>
    %c3_i32_17 = arith.constant 3 : i32
    %64 = vector.broadcast %c3_i32_17 : i32 to vector<128x1xi32>
    %65 = arith.cmpi eq, %37, %64 : vector<128x1xi32>
    %66 = vector.extract_strided_slice %40 {offsets = [0, 48], sizes = [128, 16], strides = [1, 1]} : vector<128x64xf32> to vector<128x16xf32>
    %cst_18 = arith.constant 0.000000e+00 : f32
    %67 = vector.shape_cast %65 : vector<128x1xi1> to vector<128x1xi1>
    %68 = vector.broadcast %67 : vector<128x1xi1> to vector<128x16xi1>
    %69 = vector.broadcast %cst_18 : f32 to vector<128x16xf32>
    %70 = arith.select %68, %66, %69 : vector<128x16xi1>, vector<128x16xf32>
    %71 = arith.addf %63, %70 : vector<128x16xf32>
    %c0_19 = arith.constant 0 : index
    %c0_20 = arith.constant 0 : index
    %72 = vector.load %arg5[%c0_19, %c0_20] : memref<128x16xf32, #tpu.memory_space<vmem>>, vector<128x16xf32>
    tpu.vector_store %arg5[%c0_19, %c0_20], %71 {strides = array<i32>} : memref<128x16xf32, #tpu.memory_space<vmem>>, vector<128x16xf32>,
    return
  }
  func.func @transform_0(%arg0: i32) -> (i32, i32) {
    %c0_i32 = arith.constant 0 : i32
    %c0_i32_0 = arith.constant 0 : i32
    return %arg0, %c0_i32 : i32, i32
  }
  func.func @transform_1(%arg0: i32) -> (i32, i32) {
    %c0_i32 = arith.constant 0 : i32
    %c0_i32_0 = arith.constant 0 : i32
    return %arg0, %c0_i32 : i32, i32
  }
  func.func @transform_2(%arg0: i32) -> (i32, i32) {
    %c0_i32 = arith.constant 0 : i32
    %c0_i32_0 = arith.constant 0 : i32
    %c0_i32_1 = arith.constant 0 : i32
    return %c0_i32, %c0_i32_0 : i32, i32
  }
  func.func @transform_3(%arg0: i32) -> (i32, i32) {
    %c0_i32 = arith.constant 0 : i32
    %c0_i32_0 = arith.constant 0 : i32
    %c0_i32_1 = arith.constant 0 : i32
    return %c0_i32, %c0_i32_0 : i32, i32
  }
  func.func @transform_4(%arg0: i32) -> (i32, i32) {
    %c0_i32 = arith.constant 0 : i32
    %c0_i32_0 = arith.constant 0 : i32
    return %arg0, %c0_i32 : i32, i32
  }
}

</mosaic_0001>

<bundles_post_ra>
// kernel: tpu_custom_call.1
= control target key start
LH: loop header
LB: loop body
LE: loop exit
PB: predicated region body
PF: predicated region fallthrough
CT: control target
= control target key end

     0   :  { %s1637_s15 = smov 0   ;;  %s2679_s0 = inlined_call_operand.vmem [shape: f32[256,32], index: 0, kind: input, shape index: {}]   ;;  %s2680_s1 = inlined_call_operand.vmem [shape: f32[256,16], index: 1, kind: input, shape index: {}]   ;;  %s2681_s2 = inlined_call_operand.vmem [shape: f32[4,16], index: 2, kind: input, shape index: {}]   ;;  %s2682_s3 = inlined_call_operand.vmem [shape: f32[32,64], index: 3, kind: input, shape index: {}]   ;;  %s2683_s4 = inlined_call_operand.vmem [shape: f32[256,16], index: 4, kind: output, shape index: {}]  }
   0x1 LB: > { %s1499_s16 = sadd.s32 4294967295, %s1606_s15   ;;  %p1503_p0 = scmp.ge.s32.totalorder %s1606_s15, 1  ;;  %s1606_s15 = sphi %s1637_s15, %s14_s15  }
   0x2   : > { %p174_p1 = scmp.lt.s32.totalorder %s1606_s15, 3 }
   0x4   : > { %p175_p2 = pnand %p1503_p0, %p174_p1 }
   0x5   : > { %s1504_s17 = sshll.u32 (!%p175_p2), %s1499_s16, 4  ;;  %s1609_s9 = smov (!%p175_p2), 112  }
   0x6   : > { %178 = sbr.rel (%p175_p2) target bundleno = 488 (0x1e8), region = 36  ;;  %p206_p3 = scmp.lt.s32.totalorder (!%p175_p2), %s1504_s17, 31 }
   0x7   : > { %s1610_s10 = smov (!%p175_p2), 96   ;;  %s1611_s11 = smov (!%p175_p2), 80  }
   0xb   : > { %v240_v0 = vlaneseq  ;;  %v724_v1 = vld [vmem:[%s2682_s3 + $0x18] sm:$0xff]  ;;  %v723_v2 = vld [vmem:[%s2682_s3 + $0x10] sm:$0xff]  ;;  %v722_v4 = vld [vmem:[%s2682_s3 + $0x8] sm:$0xff]  ;;  %s2685_s17 = smov (!%p206_p3, %s1504_s17), 31  ;;  %vm276_vm0 = vcmask 130048   ;;  %vm725_vm1 = vcmask 261120  }
   0xc   : > { %1548 = vmatprep.subr.mxu0 %v724_v1  ;;  %1580 = vmatprep.subr.mxu1 %v724_v1  ;;  %v1659_v5 = vld [vmem:[%s2681_s2] sm:$0xf]  ;;  %s1667_s28 = sshll.u32 %s2685_s17, 3 }
   0xd   : > { %v1651_v3 = vshrl.u32 %v240_v0, 7  ;;  %1549 = vmatpush3.msra.mxu0 %v724_v1  ;;  %1584 = vmatpush3.msra.mxu1 %v724_v1  ;;  %v721_v7 = vld [vmem:[%s2682_s3] sm:$0xff]  ;;  %s1673_s5 = scalar_lea.vmem %s2680_s1, %s1667_s28  ;;  %s1716_s8 = scalar_lea.vmem %s2679_s0, %s1667_s28 }
   0xe   : > { %1550 = vmatprep.subr.mxu0 %v723_v2  ;;  %1581 = vmatprep.subr.mxu1 %v723_v2  ;;  %v1682_v12 = vld [vmem:[%s1673_s5 + $0x10] sm:$0xff]  ;;  %v1685_v13 = vld [vmem:[%s1673_s5] sm:$0xff]  ;;  %v1688_v14 = vld [vmem:[%s1673_s5 + $0x18] sm:$0xff]  ;;  %s2611_s14 = scalar_lea.vmem %s2683_s4, %s1667_s28 }
   0xf   : > { %v242_v6 = vsub.s32 0, %v1651_v3  ;;  %1551 = vmatpush3.msra.mxu0 %v723_v2  ;;  %1585 = vmatpush3.msra.mxu1 %v723_v2  ;;  %v459_v8 = vsub.s32 2, %v1651_v3  ;;  %v591_v9 = vsub.s32 3, %v1651_v3  ;;  %v1700_v19 = vld [vmem:[%s1673_s5 + $0x8] sm:$0xff]  ;;  %v1706_v21 = vld [vmem:[%s1673_s5 + $0x20] sm:$0xff]  ;;  %v1721_v28 = vld [vmem:[%s1673_s5 + $0x38] sm:$0xff] }
  0x10   : > { %1552 = vmatprep.subr.mxu0 %v722_v4  ;;  %1582 = vmatprep.subr.mxu1 %v722_v4  ;;  %v1703_v20 = vld [vmem:[%s1673_s5 + $0x28] sm:$0xff]  ;;  %v1724_v30 = vld [vmem:[%s1673_s5 + $0x30] sm:$0xff]  ;;  %v705_v33 = vld [vmem:[%s1716_s8] sm:$0xff] }
  0x11   : > { %v1676_v10 = vrot.slane %v1659_v5, %v242_v6  ;;  %1553 = vmatpush3.msra.mxu0 %v722_v4  ;;  %1586 = vmatpush3.msra.mxu1 %v722_v4  ;;  %v1679_v11 = vrot.slane %v1659_v5, %v459_v8  ;;  %v1691_v15 = vrot.slane %v1659_v5, %v591_v9  ;;  %v706_v34 = vld [vmem:[%s1716_s8 + $0x8] sm:$0xff]  ;;  %v707_v37 = vld [vmem:[%s1716_s8 + $0x10] sm:$0xff]  ;;  %v1742_v43 = vld [vmem:[%s1673_s5 + $0x40] sm:$0xff] }
  0x12   : > { %1554 = vmatprep.subr.mxu0 %v721_v7  ;;  %1583 = vmatprep.subr.mxu1 %v721_v7  ;;  %v1739_v42 = vld [vmem:[%s1673_s5 + $0x48] sm:$0xff]  ;;  %v713_v44 = vld [vmem:[%s1716_s8 + $0x40] sm:$0xff]  ;;  %v708_v45 = vld [vmem:[%s1716_s8 + $0x18] sm:$0xff] }
  0x13   : > { %v246_v16 = vsub.f32 %v1682_v12, %v1676_v10  ;;  %v244_v17 = vsub.f32 %v1685_v13, %v1676_v10  ;;  %v247_v18 = vsub.f32 %v1688_v14, %v1676_v10  ;;  %1555 = vmatpush3.msra.mxu0 %v721_v7  ;;  %v245_v22 = vsub.f32 %v1700_v19, %v1676_v10  ;;  %v714_v46 = vld [vmem:[%s1716_s8 + $0x48] sm:$0xff]  ;;  %v709_v49 = vld [vmem:[%s1716_s8 + $0x20] sm:$0xff]  ;;  %v715_v50 = vld [vmem:[%s1716_s8 + $0x50] sm:$0xff] }
  0x14   : > { %v249_v23 = vsub.f32 %v1703_v20, %v1676_v10  ;;  %1587 = vmatpush3.msra.mxu1 %v721_v7  ;;  %v248_v27 = vsub.f32 %v1706_v21, %v1676_v10  ;;  %v251_v36 = vsub.f32 %v1721_v28, %v1676_v10  ;;  %v250_v41 = vsub.f32 %v1724_v30, %v1676_v10  ;;  %v1758_v55 = vld [vmem:[%s1673_s5 + $0x58] sm:$0xff]  ;;  %v1762_v56 = vld [vmem:[%s1673_s5 + $0x50] sm:$0xff]  ;;  %v710_v57 = vld [vmem:[%s1716_s8 + $0x28] sm:$0xff] }
  0x15   : > { %v262_v24 = vmul.f32 %v246_v16, %v246_v16  ;;  %v260_v25 = vmul.f32 %v244_v17, %v244_v17  ;;  %v263_v26 = vmul.f32 %v247_v18, %v247_v18  ;;  %v261_v29 = vmul.f32 %v245_v22, %v245_v22  ;;  %1556 = vmatprep.mubr.msk.f32.mxu0 %vm725_vm1, %v705_v33  ;;  %v716_v58 = vld [vmem:[%s1716_s8 + $0x58] sm:$0xff]  ;;  %v711_v61 = vld [vmem:[%s1716_s8 + $0x30] sm:$0xff]  ;;  %v717_v62 = vld [vmem:[%s1716_s8 + $0x60] sm:$0xff] }
  0x16   : > { %v265_v35 = vmul.f32 %v249_v23, %v249_v23  ;;  %v264_v40 = vmul.f32 %v248_v27, %v248_v27  ;;  %1557 = vmatmul.mubr.msk.f32.vlgmr.msra.gmra.mxu0 %vm725_vm1, %v706_v34  ;;  %v267_v48 = vmul.f32 %v251_v36, %v251_v36  ;;  %v266_v52 = vmul.f32 %v250_v41, %v250_v41  ;;  %v1779_v4 = vld [vmem:[%s1673_s5 + $0x68] sm:$0xff]  ;;  %v1782_v6 = vld [vmem:[%s1673_s5 + $0x60] sm:$0xff]  ;;  %v712_v8 = vld [vmem:[%s1716_s8 + $0x38] sm:$0xff] }
  0x17   : > { %v283_v31 = vsel %vm276_vm0, %v262_v24, 0.0  ;;  %v277_v32 = vsel %vm276_vm0, %v260_v25, 0.0  ;;  %v286_v38 = vsel %vm276_vm0, %v263_v26, 0.0  ;;  %v280_v39 = vsel %vm276_vm0, %v261_v29, 0.0  ;;  %1559 = vmatprep.mubr.msk.f32.mxu0 %vm725_vm1, %v707_v37  ;;  %1568 = vmatprep.mubr.msk.f32.mxu1 %vm725_vm1, %v713_v44  ;;  %v718_v9 = vld [vmem:[%s1716_s8 + $0x68] sm:$0xff]  ;;  %v719_v18 = vld [vmem:[%s1716_s8 + $0x70] sm:$0xff] }
  0x18   : > { %284 = vadd.xlane.f32.xlu1 %v283_v31  ;;  %278 = vadd.xlane.f32.xlu0 %v277_v32  ;;  %v292_v47 = vsel %vm276_vm0, %v265_v35, 0.0  ;;  %v289_v51 = vsel %vm276_vm0, %v264_v40, 0.0  ;;  %v253_v53 = vsub.f32 %v1739_v42, %v1676_v10  ;;  %v252_v54 = vsub.f32 %v1742_v43, %v1676_v10  ;;  %v1799_v25 = vld [vmem:[%s1673_s5 + $0x78] sm:$0xff]  ;;  %v1802_v26 = vld [vmem:[%s1673_s5 + $0x70] sm:$0xff] }
  0x19   : > { %1569 = vmatmul.mubr.msk.f32.vlgmr.msra.gmra.mxu1 %vm725_vm1, %v714_v46  ;;  %v298_v59 = vsel %vm276_vm0, %v267_v48, 0.0  ;;  %v255_v60 = vsub.f32 %v1758_v55, %v1676_v10  ;;  %v295_v63 = vsel %vm276_vm0, %v266_v52, 0.0  ;;  %v254_v2 = vsub.f32 %v1762_v56, %v1676_v10  ;;  %v720_v29 = vld [vmem:[%s1716_s8 + $0x78] sm:$0xff] }
  0x1a   : > { %1560 = vmatmul.mubr.msk.f32.gmra.mxu0 %vm725_vm1, %v708_v45  ;;  %1571 = vmatprep.mubr.msk.f32.mxu1 %vm725_vm1, %v715_v50  ;;  %v269_v0 = vmul.f32 %v253_v53, %v253_v53  ;;  %v268_v1 = vmul.f32 %v252_v54, %v252_v54  ;;  %v327_v7 = vsub.s32 1, %v1651_v3  ;;  %v257_v16 = vsub.f32 %v1779_v4, %v1676_v10 }
  0x1b   : > { %1562 = vmatprep.mubr.msk.f32.mxu0 %vm725_vm1, %v709_v49  ;;  %v256_v17 = vsub.f32 %v1782_v6, %v1676_v10  ;;  %v271_v23 = vmul.f32 %v255_v60, %v255_v60  ;;  %v270_v24 = vmul.f32 %v254_v2, %v254_v2  ;;  %v259_v32 = vsub.f32 %v1799_v25, %v1676_v10 }
  0x1c   : > { %287 = vadd.xlane.f32.xlu1 %v286_v38  ;;  %281 = vadd.xlane.f32.xlu0 %v280_v39  ;;  %v304_v22 = vsel %vm276_vm0, %v269_v0, 0.0  ;;  %v301_v3 = vsel %vm276_vm0, %v268_v1, 0.0  ;;  %v1807_v27 = vrot.slane %v1659_v5, %v327_v7  ;;  %v273_v31 = vmul.f32 %v257_v16, %v257_v16 }
  0x1d   : > { %1572 = vmatmul.mubr.msk.f32.gmra.mxu1 %vm725_vm1, %v716_v58  ;;  %v310_v33 = vsel %vm276_vm0, %v271_v23, 0.0  ;;  %v307_v34 = vsel %vm276_vm0, %v270_v24, 0.0  ;;  %v272_v35 = vmul.f32 %v256_v17, %v256_v17  ;;  %v258_v36 = vsub.f32 %v1802_v26, %v1676_v10 }
  0x1e   : > { %1563 = vmatmul.mubr.msk.f32.gmra.mxu0 %vm725_vm1, %v710_v57  ;;  %1574 = vmatprep.mubr.msk.f32.mxu1 %vm725_vm1, %v717_v62  ;;  %v1819_v5 = vsub.f32 %v1685_v13, %v1679_v11  ;;  %v330_v37 = vsub.f32 %v1700_v19, %v1807_v27  ;;  %v329_v38 = vsub.f32 %v1685_v13, %v1807_v27  ;;  %v316_v44 = vsel %vm276_vm0, %v273_v31, 0.0 }
  0x1f   : > { %1565 = vmatprep.mubr.msk.f32.mxu0 %vm725_vm1, %v711_v61  ;;  %v1828_v39 = vsub.f32 %v1688_v14, %v1679_v11  ;;  %v275_v40 = vmul.f32 %v259_v32, %v259_v32  ;;  %v1832_v10 = vsub.f32 %v1682_v12, %v1679_v11  ;;  %v1836_v41 = vsub.f32 %v1703_v20, %v1679_v11 }
  0x20   : > { %293 = vadd.xlane.f32.xlu1 %v292_v47  ;;  %290 = vadd.xlane.f32.xlu0 %v289_v51  ;;  %v313_v45 = vsel %vm276_vm0, %v272_v35, 0.0  ;;  %v274_v46 = vmul.f32 %v258_v36, %v258_v36  ;;  %v1842_v47 = vsub.f32 %v1706_v21, %v1679_v11  ;;  %v1846_v48 = vsub.f32 %v1721_v28, %v1679_v11 }
  0x21   : > { %1575 = vmatmul.mubr.msk.f32.gmra.mxu1 %vm725_vm1, %v718_v9  ;;  %v346_v49 = vmul.f32 %v330_v37, %v330_v37  ;;  %v1850_v50 = vsub.f32 %v1724_v30, %v1679_v11  ;;  %v1854_v51 = vsub.f32 %v1739_v42, %v1679_v11  ;;  %v345_v52 = vmul.f32 %v329_v38, %v329_v38 }
  0x22   : > { %1566 = vmatmul.mubr.msk.f32.gmra.mxu0 %vm725_vm1, %v712_v8  ;;  %1577 = vmatprep.mubr.msk.f32.mxu1 %vm725_vm1, %v719_v18  ;;  %v332_v53 = vsub.f32 %v1688_v14, %v1807_v27  ;;  %v1860_v54 = vsub.f32 %v1742_v43, %v1679_v11  ;;  %v322_v57 = vsel %vm276_vm0, %v275_v40, 0.0  ;;  %v319_v58 = vsel %vm276_vm0, %v274_v46, 0.0 }
  0x23   : > { %v1868_v60 = vsub.f32 %v1758_v55, %v1679_v11  ;;  %v1872_v61 = vsub.f32 %v1762_v56, %v1679_v11  ;;  %v1876_v62 = vsub.f32 %v1779_v4, %v1679_v11  ;;  %v1882_v0 = vsub.f32 %v1782_v6, %v1679_v11 }
  0x24   : > { %299 = vadd.xlane.f32.xlu1 %v298_v59  ;;  %296 = vadd.xlane.f32.xlu0 %v295_v63  ;;  %v331_v59 = vsub.f32 %v1682_v12, %v1807_v27  ;;  %v334_v63 = vsub.f32 %v1703_v20, %v1807_v27  ;;  %v364_v1 = vsel %vm276_vm0, %v346_v49, 0.0  ;;  %v361_v2 = vsel %vm276_vm0, %v345_v52, 0.0 }
  0x25   : > { %1578 = vmatmul.mubr.msk.f32.gmra.mxu1 %vm725_vm1, %v720_v29  ;;  %v348_v7 = vmul.f32 %v332_v53, %v332_v53  ;;  %v1888_v8 = vsub.f32 %v1799_v25, %v1679_v11  ;;  %v333_v16 = vsub.f32 %v1706_v21, %v1807_v27  ;;  %v1894_v17 = vsub.f32 %v1802_v26, %v1679_v11 }
  0x26   : > { %v347_v9 = vmul.f32 %v331_v59, %v331_v59  ;;  %v1898_v18 = vsub.f32 %v1700_v19, %v1691_v15  ;;  %v1906_v23 = vsub.f32 %v1688_v14, %v1691_v15  ;;  %v336_v29 = vsub.f32 %v1721_v28, %v1807_v27 }
  0x27   : > { %v370_v24 = vsel %vm276_vm0, %v348_v7, 0.0  ;;  %v1913_v31 = vsub.f32 %v1682_v12, %v1691_v15  ;;  %v335_v14 = vsub.f32 %v1724_v30, %v1807_v27  ;;  %v1928_v35 = vsub.f32 %v1721_v28, %v1691_v15 }
  0x28   : > { %305 = vadd.xlane.f32.xlu1 %v304_v22  ;;  %302 = vadd.xlane.f32.xlu0 %v301_v3  ;;  %v1902_v22 = vsub.f32 %v1685_v13, %v1691_v15  ;;  %v350_v3 = vmul.f32 %v334_v63, %v334_v63  ;;  %v1917_v13 = vsub.f32 %v1703_v20, %v1691_v15  ;;  %v367_v32 = vsel %vm276_vm0, %v347_v9, 0.0 }
  0x29   : > { %v1932_v12 = vsub.f32 %v1724_v30, %v1691_v15  ;;  %v1936_v20 = vsub.f32 %v1739_v42, %v1691_v15  ;;  %v352_v37 = vmul.f32 %v336_v29, %v336_v29  ;;  %v1943_v28 = vsub.f32 %v1742_v43, %v1691_v15 }
  0x2a   : > { %v376_v36 = vsel %vm276_vm0, %v350_v3, 0.0  ;;  %v351_v30 = vmul.f32 %v335_v14, %v335_v14  ;;  %v337_v40 = vsub.f32 %v1742_v43, %v1807_v27  ;;  %v1962_v46 = vsub.f32 %v1782_v6, %v1691_v15 }
  0x2b   : > { %v382_v43 = vsel %vm276_vm0, %v352_v37, 0.0  ;;  %v340_v52 = vsub.f32 %v1758_v55, %v1807_v27  ;;  %v1969_v53 = vsub.f32 %v1799_v25, %v1691_v15  ;;  %v339_v59 = vsub.f32 %v1762_v56, %v1807_v27 }
  0x2c   : > { %311 = vadd.xlane.f32.xlu1 %v310_v33  ;;  %308 = vadd.xlane.f32.xlu0 %v307_v34  ;;  %v349_v33 = vmul.f32 %v333_v16, %v333_v16  ;;  %v1924_v34 = vsub.f32 %v1706_v21, %v1691_v15  ;;  %v338_v21 = vsub.f32 %v1739_v42, %v1807_v27 }
  0x2d   : > { %v1958_v42 = vsub.f32 %v1779_v4, %v1691_v15  ;;  %v1976_v63 = vsub.f32 %v1802_v26, %v1691_v15  ;;  %v356_v7 = vmul.f32 %v340_v52, %v340_v52  ;;  %v355_v9 = vmul.f32 %v339_v59, %v339_v59 }
  0x2e   : > { %v373_v38 = vsel %vm276_vm0, %v349_v33, 0.0  ;;  %v354_v49 = vmul.f32 %v338_v21, %v338_v21  ;;  %v341_v16 = vsub.f32 %v1782_v6, %v1807_v27  ;;  %v483_v52 = vmul.f32 %v1850_v50, %v1850_v50 }
  0x2f   : > { %v394_v3 = vsel %vm276_vm0, %v356_v7, 0.0  ;;  %v488_v50 = vmul.f32 %v1868_v60, %v1868_v60 }
  0x30   : > { %317 = vadd.xlane.f32.xlu1 %v316_v44  ;;  %314 = vadd.xlane.f32.xlu0 %v313_v45  ;;  %v1950_v44 = vsub.f32 %v1758_v55, %v1691_v15  ;;  %v1954_v45 = vsub.f32 %v1762_v56, %v1691_v15  ;;  %v342_v55 = vsub.f32 %v1779_v4, %v1807_v27 }
  0x31   : > { %v344_v15 = vsub.f32 %v1799_v25, %v1807_v27  ;;  %v357_v29 = vmul.f32 %v341_v16, %v341_v16  ;;  %v343_v4 = vsub.f32 %v1802_v26, %v1807_v27  ;;  %v477_v26 = vmul.f32 %v1819_v5, %v1819_v5 }
  0x32   : > { %v358_v56 = vmul.f32 %v342_v55, %v342_v55  ;;  %v480_v27 = vmul.f32 %v1828_v39, %v1828_v39  ;;  %v482_v5 = vmul.f32 %v1836_v41, %v1836_v41  ;;  %v511_v41 = vsel %vm276_vm0, %v483_v52, 0.0 }
  0x33   : > { %v397_v33 = vsel %vm276_vm0, %v357_v29, 0.0  ;;  %v360_v14 = vmul.f32 %v344_v15, %v344_v15  ;;  %v526_v55 = vsel %vm276_vm0, %v488_v50, 0.0  ;;  %v613_v29 = vmul.f32 %v1924_v34, %v1924_v34 }
  0x34   : > { %323 = vadd.xlane.f32.xlu1 %v322_v57  ;;  %320 = vadd.xlane.f32.xlu0 %v319_v58  ;;  %v379_v57 = vsel %vm276_vm0, %v351_v30, 0.0  ;;  %v353_v58 = vmul.f32 %v337_v40, %v337_v40  ;;  %v400_v6 = vsel %vm276_vm0, %v358_v56, 0.0  ;;  %v502_v30 = vsel %vm276_vm0, %v480_v27, 0.0 }
  0x35   : > { %v406_v25 = vsel %vm276_vm0, %v360_v14, 0.0  ;;  %v609_v56 = vmul.f32 %v1902_v22, %v1902_v22  ;;  %v614_v22 = vmul.f32 %v1917_v13, %v1917_v13  ;;  %v618_v34 = vmul.f32 %v1936_v20, %v1936_v20 }
  0x37   : > { %v652_v14 = vsel %vm276_vm0, %v618_v34, 0.0 }
  0x38   : > { %365 = vadd.xlane.f32.xlu1 %v364_v1  ;;  %362 = vadd.xlane.f32.xlu0 %v361_v2  ;;  %v388_v1 = vsel %vm276_vm0, %v354_v49, 0.0  ;;  %v385_v2 = vsel %vm276_vm0, %v353_v58, 0.0  ;;  %v508_v49 = vsel %vm276_vm0, %v482_v5, 0.0  ;;  %v485_v58 = vmul.f32 %v1860_v54, %v1860_v54 }
  0x39   : > { %v490_v54 = vmul.f32 %v1876_v62, %v1876_v62 }
  0x3b   : > { %v532_v7 = vsel %vm276_vm0, %v490_v54, 0.0  ;;  %v1608_v54 = vmov 0  }
  0x3c   : > { %371 = vadd.xlane.f32.xlu1 %v370_v24  ;;  %368 = vadd.xlane.f32.xlu0 %v367_v32  ;;  %v391_v24 = vsel %vm276_vm0, %v355_v9, 0.0  ;;  %v462_v32 = vsub.f32 %v1700_v19, %v1679_v11  ;;  %v493_v19 = vsel %vm276_vm0, %v477_v26, 0.0  ;;  %v491_v9 = vmul.f32 %v1894_v17, %v1894_v17 }
  0x3d   : > { %v612_v17 = vmul.f32 %v1906_v23, %v1906_v23  ;;  %v637_v23 = vsel %vm276_vm0, %v613_v29, 0.0  ;;  %v623_v26 = vmul.f32 %v1976_v63, %v1976_v63 }
  0x3e   : > { %v478_v21 = vmul.f32 %v462_v32, %v462_v32  ;;  %v535_v62 = vsel %vm276_vm0, %v491_v9, 0.0  ;;  %v615_v32 = vmul.f32 %v1932_v12, %v1932_v12  ;;  %v620_v12 = vmul.f32 %v1950_v44, %v1950_v44 }
  0x40   : > { %377 = vadd.xlane.f32.xlu1 %v376_v36  ;;  %374 = vadd.xlane.f32.xlu0 %v373_v38  ;;  %v359_v36 = vmul.f32 %v343_v4, %v343_v4  ;;  %v496_v11 = vsel %vm276_vm0, %v478_v21, 0.0  ;;  %v479_v38 = vmul.f32 %v1832_v10, %v1832_v10  ;;  %v484_v10 = vmul.f32 %v1846_v48, %v1846_v48 }
  0x41   : > { %v517_v48 = vsel %vm276_vm0, %v485_v58, 0.0  ;;  %v640_v4 = vsel %vm276_vm0, %v614_v22, 0.0  ;;  %v643_v13 = vsel %vm276_vm0, %v615_v32, 0.0 }
  0x42   : > { %v403_v37 = vsel %vm276_vm0, %v359_v36, 0.0  ;;  %v499_v40 = vsel %vm276_vm0, %v479_v38, 0.0  ;;  %v619_v36 = vmul.f32 %v1954_v45, %v1954_v45  ;;  %v624_v45 = vmul.f32 %v1969_v53, %v1969_v53 }
  0x44   : > { %383 = vadd.xlane.f32.xlu1 %v382_v43  ;;  %380 = vadd.xlane.f32.xlu0 %v379_v57  ;;  %v481_v43 = vmul.f32 %v1842_v47, %v1842_v47  ;;  %v514_v57 = vsel %vm276_vm0, %v484_v10, 0.0  ;;  %v486_v47 = vmul.f32 %v1854_v51, %v1854_v51  ;;  %v655_v20 = vsel %vm276_vm0, %v619_v36, 0.0 }
  0x46   : > { %v505_v39 = vsel %vm276_vm0, %v481_v43, 0.0  ;;  %v520_v59 = vsel %vm276_vm0, %v486_v47, 0.0 }
  0x48   : > { %389 = vadd.xlane.f32.xlu1 %v388_v1  ;;  %386 = vadd.xlane.f32.xlu0 %v385_v2  ;;  %v487_v1 = vmul.f32 %v1872_v61, %v1872_v61  ;;  %v489_v2 = vmul.f32 %v1882_v0, %v1882_v0  ;;  %v492_v61 = vmul.f32 %v1888_v8, %v1888_v8  ;;  %v625_v8 = vsel %vm276_vm0, %v609_v56, 0.0 }
  0x49   : > { %v610_v0 = vmul.f32 %v1898_v18, %v1898_v18 }
  0x4a   : > { %v523_v51 = vsel %vm276_vm0, %v487_v1, 0.0  ;;  %v529_v60 = vsel %vm276_vm0, %v489_v2, 0.0  ;;  %v538_v16 = vsel %vm276_vm0, %v492_v61, 0.0 }
  0x4b   : > { %v628_v15 = vsel %vm276_vm0, %v610_v0, 0.0 }
  0x4c   : > { %395 = vadd.xlane.f32.xlu1 %v394_v3  ;;  %392 = vadd.xlane.f32.xlu0 %v391_v24  ;;  %v611_v3 = vmul.f32 %v1913_v31, %v1913_v31  ;;  %v634_v24 = vsel %vm276_vm0, %v612_v17, 0.0  ;;  %v616_v31 = vmul.f32 %v1928_v35, %v1928_v35 }
  0x4e   : > { %v631_v18 = vsel %vm276_vm0, %v611_v3, 0.0 }
  0x50   : > { %401 = vadd.xlane.f32.xlu1 %v400_v6  ;;  %398 = vadd.xlane.f32.xlu0 %v397_v33  ;;  %v646_v6 = vsel %vm276_vm0, %v616_v31, 0.0  ;;  %v617_v33 = vmul.f32 %v1943_v28, %v1943_v28  ;;  %v622_v28 = vmul.f32 %v1958_v42, %v1958_v42  ;;  %v667_v42 = vsel %vm276_vm0, %v623_v26, 0.0 }
  0x52   : > { %v649_v35 = vsel %vm276_vm0, %v617_v33, 0.0  ;;  %v664_v21 = vsel %vm276_vm0, %v622_v28, 0.0 }
  0x54   : > { %407 = vadd.xlane.f32.xlu1 %v406_v25  ;;  %404 = vadd.xlane.f32.xlu0 %v403_v37  ;;  %v658_v25 = vsel %vm276_vm0, %v620_v12, 0.0  ;;  %v621_v37 = vmul.f32 %v1962_v46, %v1962_v46 }
  0x56   : > { %v661_v44 = vsel %vm276_vm0, %v621_v37, 0.0 }
  0x58   : > { %497 = vadd.xlane.f32.xlu1 %v496_v11  ;;  %494 = vadd.xlane.f32.xlu0 %v493_v19  ;;  %v670_v11 = vsel %vm276_vm0, %v624_v45, 0.0 }
  0x5c   : > { %503 = vadd.xlane.f32.xlu1 %v502_v30  ;;  %500 = vadd.xlane.f32.xlu0 %v499_v40 }
  0x60   : > { %509 = vadd.xlane.f32.xlu1 %v508_v49  ;;  %506 = vadd.xlane.f32.xlu0 %v505_v39 }
  0x64   : > { %515 = vadd.xlane.f32.xlu1 %v514_v57  ;;  %512 = vadd.xlane.f32.xlu0 %v511_v41 }
  0x68   : > { %521 = vadd.xlane.f32.xlu1 %v520_v59  ;;  %518 = vadd.xlane.f32.xlu0 %v517_v48 }
  0x6c   : > { %527 = vadd.xlane.f32.xlu1 %v526_v55  ;;  %524 = vadd.xlane.f32.xlu0 %v523_v51 }
  0x70   : > { %533 = vadd.xlane.f32.xlu1 %v532_v7  ;;  %530 = vadd.xlane.f32.xlu0 %v529_v60 }
  0x74   : > { %539 = vadd.xlane.f32.xlu1 %v538_v16  ;;  %536 = vadd.xlane.f32.xlu0 %v535_v62 }
  0x78   : > { %629 = vadd.xlane.f32.xlu1 %v628_v15  ;;  %626 = vadd.xlane.f32.xlu0 %v625_v8 }
  0x7c   : > { %635 = vadd.xlane.f32.xlu1 %v634_v24  ;;  %632 = vadd.xlane.f32.xlu0 %v631_v18 }
  0x80   : > { %641 = vadd.xlane.f32.xlu1 %v640_v4  ;;  %638 = vadd.xlane.f32.xlu0 %v637_v23 }
  0x84   : > { %647 = vadd.xlane.f32.xlu1 %v646_v6  ;;  %644 = vadd.xlane.f32.xlu0 %v643_v13 }
  0x88   : > { %653 = vadd.xlane.f32.xlu1 %v652_v14  ;;  %650 = vadd.xlane.f32.xlu0 %v649_v35 }
  0x8c   : > { %659 = vadd.xlane.f32.xlu1 %v658_v25  ;;  %656 = vadd.xlane.f32.xlu0 %v655_v20 }
  0x90   : > { %665 = vadd.xlane.f32.xlu1 %v664_v21  ;;  %662 = vadd.xlane.f32.xlu0 %v661_v44 }
  0x94   : > { %671 = vadd.xlane.f32.xlu1 %v670_v11  ;;  %668 = vadd.xlane.f32.xlu0 %v667_v42 }
  0xa1   : > { %v2090_v46 = vpop.xlane.xlu1 %284  ;;  %v2092_v19 = vpop.xlane.xlu0 %278 }
  0xa5   : > { %v2094_v27 = vpop.xlane.xlu1 %287  ;;  %v2096_v38 = vpop.xlane.xlu0 %281 }
  0xa9   : > { %v294_v53 = vpop.xlane.xlu1 %293  ;;  %v291_v30 = vpop.xlane.xlu0 %290 }
  0xad   : > { %v300_v40 = vpop.xlane.xlu1 %299  ;;  %v297_v63 = vpop.xlane.xlu0 %296 }
  0xb1   : > { %v2098_v5 = vpop.xlane.xlu1 %305  ;;  %v2100_v43 = vpop.xlane.xlu0 %302 }
  0xb5   : > { %v2102_v49 = vpop.xlane.xlu1 %311  ;;  %v2104_v39 = vpop.xlane.xlu0 %308 }
  0xb9   : > { %v2106_v10 = vpop.xlane.xlu1 %317  ;;  %v2108_v52 = vpop.xlane.xlu0 %314 }
  0xbd   : > { %v2110_v57 = vpop.xlane.xlu1 %323  ;;  %v321_v41 = vpop.xlane.xlu0 %320 }
  0xc1   : > { %v2112_v47 = vpop.xlane.xlu1 %365  ;;  %v2114_v58 = vpop.xlane.xlu0 %362 }
  0xc2   : > { %vm410_vm14 = vcmp.lt.f32.partialorder %v2112_v47, %v2096_v38  ;;  %vm409_vm15 = vcmp.lt.f32.partialorder %v2114_v58, %v2092_v19 }
  0xc5   : > { %v2116_v59 = vpop.xlane.xlu1 %371  ;;  %v2118_v48 = vpop.xlane.xlu0 %368 }
  0xc9   : > { %v378_v50 = vpop.xlane.xlu1 %377  ;;  %v375_v1 = vpop.xlane.xlu0 %374 }
  0xca   : > { %vm414_vm7 = vcmp.lt.f32.partialorder %v378_v50, %v294_v53  ;;  %vm413_vm8 = vcmp.lt.f32.partialorder %v375_v1, %v291_v30 }
  0xcb   : > { %v430_v23 = vsel %vm414_vm7, %v378_v50, %v294_v53  ;;  %v429_v31 = vsel %vm413_vm8, %v375_v1, %v291_v30  ;;  %v446_v13 = vsel %vm414_vm7, 1, %v1608_v54  ;;  %v445_v34 = vsel %vm413_vm8, 1, %v1608_v54 }
  0xcd   : > { %v384_v55 = vpop.xlane.xlu1 %383  ;;  %v381_v51 = vpop.xlane.xlu0 %380 }
  0xce   : > { %vm416_vm2 = vcmp.lt.f32.partialorder %v384_v55, %v300_v40  ;;  %vm415_vm3 = vcmp.lt.f32.partialorder %v381_v51, %v297_v63 }
  0xcf   : > { %v448_v2 = vsel %vm416_vm2, 1, %v1608_v54  ;;  %v447_v7 = vsel %vm415_vm3, 1, %v1608_v54  ;;  %v432_v36 = vsel %vm416_vm2, %v384_v55, %v300_v40  ;;  %v431_v25 = vsel %vm415_vm3, %v381_v51, %v297_v63 }
  0xd0   : > { %v425_v51 = vsel %vm409_vm15, %v2114_v58, %v2092_v19 }
  0xd1   : > { %v2124_v60 = vpop.xlane.xlu1 %389  ;;  %v2126_v61 = vpop.xlane.xlu0 %386 }
  0xd5   : > { %v2128_v9 = vpop.xlane.xlu1 %395  ;;  %v2130_v16 = vpop.xlane.xlu0 %392 }
  0xd9   : > { %v402_v62 = vpop.xlane.xlu1 %401  ;;  %v399_v0 = vpop.xlane.xlu0 %398 }
  0xda   : > { %vm421_vm4 = vcmp.lt.f32.partialorder %v399_v0, %v2108_v52  ;;  %vm422_vm13 = vcmp.lt.f32.partialorder %v402_v62, %v2106_v10 }
  0xdb   : > { %v2136_v56 = vsel %vm421_vm4, %v399_v0, %v2108_v52  ;;  %v438_v30 = vsel %vm422_vm13, %v402_v62, %v2106_v10  ;;  %v453_v50 = vsel %vm421_vm4, 1, %v1608_v54  ;;  %v426_v52 = vsel %vm410_vm14, %v2112_v47, %v2096_v38  ;;  %v2217_v0 = vpop.f32.mrf.mxu0 }
  0xdd   : > { %v408_v15 = vpop.xlane.xlu1 %407  ;;  %v405_v8 = vpop.xlane.xlu0 %404 }
  0xde   : > { %vm424_vm5 = vcmp.lt.f32.partialorder %v408_v15, %v2110_v57  ;;  %vm423_vm6 = vcmp.lt.f32.partialorder %v405_v8, %v321_v41  ;;  %v2241_v38 = vpop.f32.mrf.mxu0 }
  0xdf   : > { %v456_v17 = vsel %vm424_vm5, 1, %v1608_v54  ;;  %v439_v3 = vsel %vm423_vm6, %v405_v8, %v321_v41  ;;  %v455_v24 = vsel %vm423_vm6, 1, %v1608_v54  ;;  %v454_v41 = vsel %vm422_vm13, 1, %v1608_v54 }
  0xe1   : > { %v2143_v18 = vpop.xlane.xlu1 %497  ;;  %v2145_v22 = vpop.xlane.xlu0 %494 }
  0xe2   : > { %vm542_vm3 = vcmp.lt.f32.partialorder %v2143_v18, %v426_v52  ;;  %vm541_vm4 = vcmp.lt.f32.partialorder %v2145_v22, %v425_v51 }
  0xe5   : > { %v2147_v29 = vpop.xlane.xlu1 %503  ;;  %v2149_v4 = vpop.xlane.xlu0 %500 }
  0xe9   : > { %v510_v32 = vpop.xlane.xlu1 %509  ;;  %v507_v6 = vpop.xlane.xlu0 %506 }
  0xea   : > { %vm546_vm9 = vcmp.lt.f32.partialorder %v510_v32, %v430_v23  ;;  %vm545_vm10 = vcmp.lt.f32.partialorder %v507_v6, %v429_v31 }
  0xeb   : > { %v2153_v33 = vsel %vm546_vm9, %v510_v32, %v430_v23  ;;  %v2155_v14 = vsel %vm546_vm9, 2, %v446_v13  ;;  %v2157_v35 = vsel %vm545_vm10, %v507_v6, %v429_v31  ;;  %v2159_v12 = vsel %vm545_vm10, 2, %v445_v34 }
  0xec   : > { %v558_v13 = vsel %vm542_vm3, %v2143_v18, %v426_v52 }
  0xed   : > { %v516_v20 = vpop.xlane.xlu1 %515  ;;  %v513_v28 = vpop.xlane.xlu0 %512 }
  0xee   : > { %vm548_vm11 = vcmp.lt.f32.partialorder %v516_v20, %v432_v36  ;;  %vm547_vm12 = vcmp.lt.f32.partialorder %v513_v28, %v431_v25 }
  0xef   : > { %v2163_v37 = vsel %vm548_vm11, %v516_v20, %v432_v36  ;;  %v2165_v21 = vsel %vm548_vm11, 2, %v448_v2  ;;  %v2167_v44 = vsel %vm547_vm12, %v513_v28, %v431_v25  ;;  %v2169_v45 = vsel %vm547_vm12, 2, %v447_v7 }
  0xf0   : > { %v440_v2 = vsel %vm424_vm5, %v408_v15, %v2110_v57  ;;  %v442_v57 = vsel %vm410_vm14, 1, %v1608_v54  ;;  %v441_v15 = vsel %vm409_vm15, 1, %v1608_v54  ;;  %vm418_vm11 = vcmp.lt.f32.partialorder %v2124_v60, %v2098_v5 }
  0xf1   : > { %v2171_v26 = vpop.xlane.xlu1 %521  ;;  %v2173_v11 = vpop.xlane.xlu0 %518  ;;  %v573_v34 = vsel %vm541_vm4, 2, %v441_v15  ;;  %vm417_vm12 = vcmp.lt.f32.partialorder %v2126_v61, %v2100_v43 }
  0xf5   : > { %v2175_v42 = vpop.xlane.xlu1 %527  ;;  %v2177_v53 = vpop.xlane.xlu0 %524 }
  0xf9   : > { %v534_v40 = vpop.xlane.xlu1 %533  ;;  %v2185_v63 = vpop.xlane.xlu0 %530 }
  0xfa   : > { %vm554_vm1 = vcmp.lt.f32.partialorder %v534_v40, %v438_v30  ;;  %vm553_vm2 = vcmp.lt.f32.partialorder %v2185_v63, %v2136_v56 }
  0xfb   : > { %v2193_v1 = vsel %vm554_vm1, %v534_v40, %v438_v30  ;;  %v2195_v55 = vsel %vm554_vm1, 2, %v454_v41  ;;  %v2200_v10 = vsel %vm553_vm2, 2, %v453_v50  ;;  %v2269_v40 = vpop.f32.mrf.mxu1  ;;  %v434_v41 = vsel %vm418_vm11, %v2124_v60, %v2098_v5 }
  0xfc   : > { %vm550_vm15 = vcmp.lt.f32.partialorder %v2171_v26, %v434_v41 }
  0xfd   : > { %v540_v7 = vpop.xlane.xlu1 %539  ;;  %v537_v62 = vpop.xlane.xlu0 %536 }
  0xfe   : > { %vm556_vm6 = vcmp.lt.f32.partialorder %v540_v7, %v440_v2  ;;  %vm555_vm7 = vcmp.lt.f32.partialorder %v537_v62, %v439_v3  ;;  %v2291_v52 = vpop.f32.mrf.mxu1 }
  0xff   : > { %v2219_v8 = vsel %vm556_vm6, %v540_v7, %v440_v2  ;;  %v2221_v23 = vsel %vm556_vm6, 2, %v456_v17  ;;  %v2223_v31 = vsel %vm555_vm7, %v537_v62, %v439_v3  ;;  %v2225_v32 = vsel %vm555_vm7, 2, %v455_v24 }
 0x100   : > { %v557_v17 = vsel %vm541_vm4, %v2145_v22, %v425_v51  ;;  %v574_v24 = vsel %vm542_vm3, 2, %v442_v57  ;;  %v450_v51 = vsel %vm418_vm11, 1, %v1608_v54  ;;  %v2317_v60 = vpop.f32.mrf.mxu1 }
 0x101   : > { %v630_v6 = vpop.xlane.xlu1 %629  ;;  %v627_v3 = vpop.xlane.xlu0 %626  ;;  %v582_v62 = vsel %vm550_vm15, 2, %v450_v51 }
 0x102   : > { %vm674_vm5 = vcmp.lt.f32.partialorder %v630_v6, %v558_v13  ;;  %vm673_vm8 = vcmp.lt.f32.partialorder %v627_v3, %v557_v17 }
 0x103   : > { %v2243_v47 = vsel %vm674_vm5, 3, %v574_v24  ;;  %v2245_v19 = vsel %vm673_vm8, 3, %v573_v34  ;;  %vm412_vm5 = vcmp.lt.f32.partialorder %v2116_v59, %v2094_v27  ;;  %vm411_vm8 = vcmp.lt.f32.partialorder %v2118_v48, %v2090_v46 }
 0x104   : > { %vm984_vm9 = vcmp.eq.s32.totalorder %v2243_v47, 1  ;;  %vm983_vm10 = vcmp.eq.s32.totalorder %v2245_v19, 1  ;;  %v428_v6 = vsel %vm412_vm5, %v2116_v59, %v2094_v27  ;;  %v444_v17 = vsel %vm412_vm5, 1, %v1608_v54  ;;  %v2362_v59 = vpop.f32.mrf.mxu1 }
 0x105   : > { %v2249_v58 = vpop.xlane.xlu1 %635  ;;  %v2251_v18 = vpop.xlane.xlu0 %632  ;;  %v1032_v36 = vsel %vm984_vm9, %v2217_v0, 0.0  ;;  %v1031_v22 = vsel %vm983_vm10, %v2241_v38, 0.0  ;;  %vm420_vm9 = vcmp.lt.f32.partialorder %v2128_v9, %v2102_v49  ;;  %vm419_vm10 = vcmp.lt.f32.partialorder %v2130_v16, %v2104_v39 }
 0x106   : > { %1065 = vrot.lane.b32.xlu1 %v1032_v36, %s1609_s9  ;;  %1063 = vrot.lane.b32.xlu0 %v1031_v22, %s1609_s9  ;;  %v427_v3 = vsel %vm411_vm8, %v2118_v48, %v2090_v46  ;;  %v436_v24 = vsel %vm420_vm9, %v2128_v9, %v2102_v49  ;;  %v435_v34 = vsel %vm419_vm10, %v2130_v16, %v2104_v39  ;;  %v451_v27 = vsel %vm419_vm10, 1, %v1608_v54 }
 0x107   : > { %v569_v22 = vsel %vm553_vm2, %v2185_v63, %v2136_v56 }
 0x109   : > { %v642_v25 = vpop.xlane.xlu1 %641  ;;  %v639_v20 = vpop.xlane.xlu0 %638 }
 0x10a   : > { %vm678_vm13 = vcmp.lt.f32.partialorder %v642_v25, %v2153_v33  ;;  %vm677_vm14 = vcmp.lt.f32.partialorder %v639_v20, %v2157_v35  ;;  %v433_v33 = vsel %vm417_vm12, %v2126_v61, %v2100_v43 }
 0x10b   : > { %v2264_v28 = vsel %vm678_vm13, 3, %v2155_v14  ;;  %v2267_v30 = vsel %vm677_vm14, 3, %v2159_v12  ;;  %vm549_vm1 = vcmp.lt.f32.partialorder %v2173_v11, %v433_v33  ;;  %vm1128_vm13 = vcmp.eq.s32.totalorder %v2243_v47, 2 }
 0x10c   : > { %vm1127_vm14 = vcmp.eq.s32.totalorder %v2245_v19, 2  ;;  %v1176_v39 = vsel %vm1128_vm13, %v2217_v0, 0.0 }
 0x10d   : > { %v648_v35 = vpop.xlane.xlu1 %647  ;;  %v645_v14 = vpop.xlane.xlu0 %644  ;;  %v1175_v16 = vsel %vm1127_vm14, %v2241_v38, 0.0  ;;  %vm1272_vm14 = vcmp.eq.s32.totalorder %v2243_v47, 3 }
 0x10e   : > { %vm680_vm3 = vcmp.lt.f32.partialorder %v648_v35, %v2163_v37  ;;  %vm679_vm4 = vcmp.lt.f32.partialorder %v645_v14, %v2167_v44  ;;  %v449_v37 = vsel %vm417_vm12, 1, %v1608_v54  ;;  %v566_v44 = vsel %vm550_vm15, %v2171_v26, %v434_v41  ;;  %v2397_v14 = vpop.f32.mrf.mxu1 }
 0x10f   : > { %v2286_v12 = vsel %vm680_vm3, 3, %v2165_v21  ;;  %v2289_v50 = vsel %vm679_vm4, 3, %v2169_v45  ;;  %v565_v21 = vsel %vm549_vm1, %v2173_v11, %v433_v33  ;;  %v2303_v45 = vpop.f32.mrf.mxu0  ;;  %v581_v57 = vsel %vm549_vm1, 2, %v449_v37 }
 0x110   : > { %vm544_vm15 = vcmp.lt.f32.partialorder %v2147_v29, %v428_v6  ;;  %vm543_vm1 = vcmp.lt.f32.partialorder %v2149_v4, %v427_v3  ;;  %vm551_vm3 = vcmp.lt.f32.partialorder %v2177_v53, %v435_v34  ;;  %vm552_vm4 = vcmp.lt.f32.partialorder %v2175_v42, %v436_v24 }
 0x111   : > { %v654_v2 = vpop.xlane.xlu1 %653  ;;  %v651_v7 = vpop.xlane.xlu0 %650  ;;  %v560_v56 = vsel %vm544_vm15, %v2147_v29, %v428_v6  ;;  %v567_v63 = vsel %vm551_vm3, %v2177_v53, %v435_v34  ;;  %v576_v33 = vsel %vm544_vm15, 2, %v444_v17  ;;  %v559_v35 = vsel %vm543_vm1, %v2149_v4, %v427_v3 }
 0x112   : > { %vm682_vm6 = vcmp.lt.f32.partialorder %v654_v2, %v566_v44  ;;  %vm681_vm7 = vcmp.lt.f32.partialorder %v651_v7, %v565_v21  ;;  %v2330_v13 = vpop.f32.mrf.mxu0  ;;  %vm676_vm2 = vcmp.lt.f32.partialorder %v2249_v58, %v560_v56  ;;  %vm1271_vm15 = vcmp.eq.s32.totalorder %v2245_v19, 3 }
 0x113   : > { %v2309_v5 = vsel %vm682_vm6, 3, %v582_v62  ;;  %v2311_v43 = vsel %vm681_vm7, 3, %v581_v57  ;;  %v2416_v53 = vsel %vm676_vm2, 3, %v576_v33  ;;  %v443_v58 = vsel %vm411_vm8, 1, %v1608_v54 }
 0x114   : > { %vm992_vm11 = vcmp.eq.s32.totalorder %v2309_v5, 1  ;;  %vm991_vm12 = vcmp.eq.s32.totalorder %v2311_v43, 1  ;;  %v2372_v20 = vpop.f32.mrf.mxu0  ;;  %vm1136_vm5 = vcmp.eq.s32.totalorder %v2309_v5, 2  ;;  %vm1135_vm10 = vcmp.eq.s32.totalorder %v2311_v43, 2 }
 0x115   : > { %v2321_v61 = vpop.xlane.xlu1 %659  ;;  %v657_v26 = vpop.xlane.xlu0 %656  ;;  %v1040_v11 = vsel %vm992_vm11, %v2269_v40, 0.0  ;;  %v1039_v15 = vsel %vm991_vm12, %v2291_v52, 0.0  ;;  %v1184_v29 = vsel %vm1136_vm5, %v2269_v40, 0.0  ;;  %v1183_v44 = vsel %vm1135_vm10, %v2291_v52, 0.0 }
 0x116   : > { %1081 = vrot.lane.b32.xlu1 %v1040_v11, %s1609_s9  ;;  %1079 = vrot.lane.b32.xlu0 %v1039_v15, %s1609_s9  ;;  %vm683_vm11 = vcmp.lt.f32.partialorder %v657_v26, %v567_v63  ;;  %v2406_v2 = vpop.f32.mrf.mxu0  ;;  %v1320_v62 = vsel %vm1272_vm14, %v2217_v0, 0.0  ;;  %vm925_vm10 = vcmp.eq.s32.totalorder %v2289_v50, 0  ;;  %vm1130_vm2 = vcmp.eq.s32.totalorder %v2416_v53, 2 }
 0x117   : > { %v1178_v34 = vsel %vm1130_vm2, %v2303_v45, 0.0  ;;  %vm1275_vm2 = vcmp.eq.s32.totalorder %v2267_v30, 3 }
 0x118   : > { %v2443_v57 = vpop.f32.mrf.mxu0 }
 0x119   : > { %v666_v36 = vpop.xlane.xlu1 %665  ;;  %v663_v25 = vpop.xlane.xlu0 %662 }
 0x11a   : > { %vm686_vm6 = vcmp.lt.f32.partialorder %v666_v36, %v2193_v1  ;;  %vm685_vm7 = vcmp.lt.f32.partialorder %v663_v25, %v569_v22  ;;  %1209 = vrot.lane.b32.xlu1 %v1176_v39, %s1610_s10  ;;  %1207 = vrot.lane.b32.xlu0 %v1175_v16, %s1610_s10 }
 0x11b   : > { %v2386_v1 = vsel %vm686_vm6, 3, %v2195_v55  ;;  %v2389_v41 = vsel %vm685_vm7, 3, %v2200_v10  ;;  %v568_v55 = vsel %vm552_vm4, %v2175_v42, %v436_v24  ;;  %v583_v10 = vsel %vm551_vm3, 2, %v451_v27  ;;  %v2463_v42 = vpop.f32.mrf.mxu0 }
 0x11c   : > { %v2419_v21 = vsel %vm683_vm11, 3, %v583_v10  ;;  %vm675_vm3 = vcmp.lt.f32.partialorder %v2251_v18, %v559_v35  ;;  %vm684_vm6 = vcmp.lt.f32.partialorder %v2321_v61, %v568_v55  ;;  %v575_v18 = vsel %vm543_vm1, 2, %v443_v58 }
 0x11d   : > { %v672_v51 = vpop.xlane.xlu1 %671  ;;  %v669_v37 = vpop.xlane.xlu0 %668  ;;  %vm993_vm8 = vcmp.eq.s32.totalorder %v2419_v21, 1  ;;  %v2451_v46 = vsel %vm675_vm3, 3, %v575_v18  ;;  %vm929_vm1 = vcmp.eq.s32.totalorder %v2419_v21, 0  ;;  %vm931_vm5 = vcmp.eq.s32.totalorder %v2389_v41, 0 }
 0x11e   : > { %vm688_vm12 = vcmp.lt.f32.partialorder %v672_v51, %v2219_v8  ;;  %vm687_vm13 = vcmp.lt.f32.partialorder %v669_v37, %v2223_v31  ;;  %1225 = vrot.lane.b32.xlu1 %v1184_v29, %s1610_s10  ;;  %1223 = vrot.lane.b32.xlu0 %v1183_v44, %s1610_s10  ;;  %v2429_v31 = vpop.f32.mrf.mxu1  ;;  %v2461_v4 = vsel %vm929_vm1, %v2362_v59, 0.0  ;;  %vm1129_vm7 = vcmp.eq.s32.totalorder %v2451_v46, 2 }
 0x11f   : > { %v2422_v7 = vsel %vm688_vm12, 3, %v2221_v23  ;;  %v2425_v8 = vsel %vm687_vm13, 3, %v2225_v32  ;;  %v452_v23 = vsel %vm420_vm9, 1, %v1608_v54  ;;  %v1319_v32 = vsel %vm1271_vm15, %v2241_v38, 0.0 }
 0x120   : > { %v584_v61 = vsel %vm552_vm4, 2, %v452_v23  ;;  %vm986_vm9 = vcmp.eq.s32.totalorder %v2416_v53, 1  ;;  %v2455_v48 = vpop.f32.mrf.mxu1  ;;  %v1041_v54 = vsel %vm993_vm8, %v2362_v59, 0.0  ;;  %v2471_v26 = vsel %vm931_vm5, %v2429_v31, 0.0 }
 0x121   : > { %v2453_v49 = vsel %vm684_vm6, 3, %v584_v61  ;;  %v1034_v9 = vsel %vm986_vm9, %v2303_v45, 0.0  ;;  %v1177_v6 = vsel %vm1129_vm7, %v2330_v13, 0.0  ;;  %v2479_v17 = vsel %vm925_vm10, %v2463_v42, 0.0 }
 0x122   : > { %1353 = vrot.lane.b32.xlu1 %v1320_v62, %s1611_s11  ;;  %1351 = vrot.lane.b32.xlu0 %v1319_v32, %s1611_s11  ;;  %vm994_vm4 = vcmp.eq.s32.totalorder %v2453_v49, 1  ;;  %v2473_v11 = vpop.f32.mrf.mxu1  ;;  %vm1137_vm11 = vcmp.eq.s32.totalorder %v2419_v21, 2  ;;  %vm933_vm12 = vcmp.eq.s32.totalorder %v2425_v8, 0  ;;  %vm934_vm13 = vcmp.eq.s32.totalorder %v2422_v7, 0 }
 0x123   : > { %v1042_v15 = vsel %vm994_vm4, %v2317_v60, 0.0  ;;  %v2488_v3 = vsel %vm933_vm12, %v2473_v11, 0.0  ;;  %v2491_v24 = vsel %vm934_vm13, %v2455_v48, 0.0  ;;  %v1185_v27 = vsel %vm1137_vm11, %v2362_v59, 0.0 }
 0x124   : > { %vm1138_vm14 = vcmp.eq.s32.totalorder %v2453_v49, 2  ;;  %vm1273_vm15 = vcmp.eq.s32.totalorder %v2451_v46, 3  ;;  %vm1274_vm3 = vcmp.eq.s32.totalorder %v2416_v53, 3  ;;  %vm987_vm6 = vcmp.eq.s32.totalorder %v2267_v30, 1 }
 0x125   : > { %v1186_v36 = vsel %vm1138_vm14, %v2317_v60, 0.0  ;;  %v1321_v22 = vsel %vm1273_vm15, %v2330_v13, 0.0  ;;  %v1322_v25 = vsel %vm1274_vm3, %v2303_v45, 0.0  ;;  %v1035_v39 = vsel %vm987_vm6, %v2406_v2, 0.0 }
 0x126   : > { %1083 = vrot.lane.b32.xlu0 %v1041_v54, %s1609_s9  ;;  %1069 = vrot.lane.b32.xlu1 %v1034_v9, %s1609_s9  ;;  %vm985_vm8 = vcmp.eq.s32.totalorder %v2451_v46, 1  ;;  %vm995_vm9 = vcmp.eq.s32.totalorder %v2389_v41, 1  ;;  %vm988_vm1 = vcmp.eq.s32.totalorder %v2264_v28, 1  ;;  %vm1131_vm4 = vcmp.eq.s32.totalorder %v2267_v30, 2 }
 0x127   : > { %v1033_v16 = vsel %vm985_vm8, %v2330_v13, 0.0  ;;  %v1043_v56 = vsel %vm995_vm9, %v2429_v31, 0.0  ;;  %v1036_v63 = vsel %vm988_vm1, %v2372_v20, 0.0  ;;  %v1179_v33 = vsel %vm1131_vm4, %v2406_v2, 0.0 }
 0x128   : > { %vm996_vm7 = vcmp.eq.s32.totalorder %v2386_v1, 1  ;;  %vm1139_vm5 = vcmp.eq.s32.totalorder %v2389_v41, 2  ;;  %vm1132_vm10 = vcmp.eq.s32.totalorder %v2264_v28, 2  ;;  %v1323_v51 = vsel %vm1275_vm2, %v2406_v2, 0.0 }
 0x129   : > { %v1044_v35 = vsel %vm996_vm7, %v2397_v14, 0.0  ;;  %v1187_v55 = vsel %vm1139_vm5, %v2429_v31, 0.0  ;;  %v1180_v10 = vsel %vm1132_vm10, %v2372_v20, 0.0  ;;  %vm1140_vm11 = vcmp.eq.s32.totalorder %v2386_v1, 2 }
 0x12a   : > { %1085 = vrot.lane.b32.xlu1 %v1042_v15, %s1609_s9  ;;  %1211 = vrot.lane.b32.xlu0 %v1177_v6, %s1610_s10  ;;  %vm989_vm12 = vcmp.eq.s32.totalorder %v2289_v50, 1  ;;  %v1188_v37 = vsel %vm1140_vm11, %v2397_v14, 0.0  ;;  %vm990_vm13 = vcmp.eq.s32.totalorder %v2286_v12, 1  ;;  %vm997_vm14 = vcmp.eq.s32.totalorder %v2425_v8, 1 }
 0x12b   : > { %v1037_v29 = vsel %vm989_vm12, %v2463_v42, 0.0  ;;  %v1038_v44 = vsel %vm990_vm13, %v2443_v57, 0.0  ;;  %v1045_v58 = vsel %vm997_vm14, %v2473_v11, 0.0  ;;  %vm998_vm15 = vcmp.eq.s32.totalorder %v2422_v7, 1 }
 0x12c   : > { %vm1133_vm3 = vcmp.eq.s32.totalorder %v2289_v50, 2  ;;  %v1046_v23 = vsel %vm998_vm15, %v2455_v48, 0.0  ;;  %vm1134_vm6 = vcmp.eq.s32.totalorder %v2286_v12, 2  ;;  %vm1141_vm8 = vcmp.eq.s32.totalorder %v2425_v8, 2 }
 0x12d   : > { %v1181_v62 = vsel %vm1133_vm3, %v2463_v42, 0.0  ;;  %v1182_v32 = vsel %vm1134_vm6, %v2443_v57, 0.0  ;;  %v1189_v18 = vsel %vm1141_vm8, %v2473_v11, 0.0  ;;  %vm1142_vm9 = vcmp.eq.s32.totalorder %v2422_v7, 2 }
 0x12e   : > { %1213 = vrot.lane.b32.xlu1 %v1178_v34, %s1610_s10  ;;  %1227 = vrot.lane.b32.xlu0 %v1185_v27, %s1610_s10  ;;  %vm1277_vm1 = vcmp.eq.s32.totalorder %v2289_v50, 3  ;;  %v1190_v61 = vsel %vm1142_vm9, %v2455_v48, 0.0  ;;  %vm1276_vm4 = vcmp.eq.s32.totalorder %v2264_v28, 3  ;;  %vm1279_vm7 = vcmp.eq.s32.totalorder %v2311_v43, 3 }
 0x12f   : > { %v1325_v54 = vsel %vm1277_vm1, %v2463_v42, 0.0  ;;  %v1324_v9 = vsel %vm1276_vm4, %v2372_v20, 0.0  ;;  %v1327_v15 = vsel %vm1279_vm7, %v2291_v52, 0.0  ;;  %vm1278_vm5 = vcmp.eq.s32.totalorder %v2286_v12, 3 }
 0x130   : > { %vm1281_vm10 = vcmp.eq.s32.totalorder %v2419_v21, 3  ;;  %v1326_v50 = vsel %vm1278_vm5, %v2443_v57, 0.0  ;;  %vm1280_vm2 = vcmp.eq.s32.totalorder %v2309_v5, 3  ;;  %vm1283_vm11 = vcmp.eq.s32.totalorder %v2389_v41, 3 }
 0x131   : > { %v1329_v42 = vsel %vm1281_vm10, %v2362_v59, 0.0  ;;  %v1328_v6 = vsel %vm1280_vm2, %v2269_v40, 0.0  ;;  %v1331_v34 = vsel %vm1283_vm11, %v2429_v31, 0.0  ;;  %vm1282_vm12 = vcmp.eq.s32.totalorder %v2453_v49, 3 }
 0x132   : > { %1229 = vrot.lane.b32.xlu1 %v1186_v36, %s1610_s10  ;;  %1355 = vrot.lane.b32.xlu0 %v1321_v22, %s1611_s11  ;;  %vm1285_vm13 = vcmp.eq.s32.totalorder %v2425_v8, 3  ;;  %v1330_v59 = vsel %vm1282_vm12, %v2317_v60, 0.0  ;;  %vm1284_vm14 = vcmp.eq.s32.totalorder %v2386_v1, 3  ;;  %vm1286_vm15 = vcmp.eq.s32.totalorder %v2422_v7, 3 }
 0x133   : > { %v1333_v21 = vsel %vm1285_vm13, %v2473_v11, 0.0  ;;  %v1332_v41 = vsel %vm1284_vm14, %v2397_v14, 0.0  ;;  %v1334_v31 = vsel %vm1286_vm15, %v2455_v48, 0.0  ;;  %vm928_vm3 = vcmp.eq.s32.totalorder %v2309_v5, 0 }
 0x134   : > { %vm927_vm6 = vcmp.eq.s32.totalorder %v2311_v43, 0  ;;  %v976_v11 = vsel %vm928_vm3, %v2269_v40, 0.0  ;;  %vm920_vm8 = vcmp.eq.s32.totalorder %v2243_v47, 0  ;;  %vm919_vm9 = vcmp.eq.s32.totalorder %v2245_v19, 0 }
 0x135   : > { %v975_v22 = vsel %vm927_vm6, %v2291_v52, 0.0  ;;  %v968_v5 = vsel %vm920_vm8, %v2217_v0, 0.0  ;;  %v967_v43 = vsel %vm919_vm9, %v2241_v38, 0.0  ;;  %vm922_vm1 = vcmp.eq.s32.totalorder %v2416_v53, 0 }
 0x136   : > { %1357 = vrot.lane.b32.xlu1 %v1322_v25, %s1611_s11  ;;  %1071 = vrot.lane.b32.xlu0 %v1035_v39, %s1609_s9  ;;  %vm921_vm4 = vcmp.eq.s32.totalorder %v2451_v46, 0  ;;  %vm923_vm7 = vcmp.eq.s32.totalorder %v2267_v30, 0  ;;  %vm924_vm5 = vcmp.eq.s32.totalorder %v2264_v28, 0  ;;  %vm926_vm10 = vcmp.eq.s32.totalorder %v2286_v12, 0 }
 0x137   : > { %v974_v28 = vsel %vm926_vm10, %v2443_v57, 0.0  ;;  %vm930_vm2 = vcmp.eq.s32.totalorder %v2453_v49, 0  ;;  %vm932_vm11 = vcmp.eq.s32.totalorder %v2386_v1, 0 }
 0x13a   : > { %1067 = vrot.lane.b32.xlu1 %v1033_v16, %s1609_s9  ;;  %1087 = vrot.lane.b32.xlu0 %v1043_v56, %s1609_s9 }
 0x13e   : > { %1073 = vrot.lane.b32.xlu1 %v1036_v63, %s1609_s9  ;;  %1215 = vrot.lane.b32.xlu0 %v1179_v33, %s1610_s10 }
 0x142   : > { %1089 = vrot.lane.b32.xlu1 %v1044_v35, %s1609_s9  ;;  %1231 = vrot.lane.b32.xlu0 %v1187_v55, %s1610_s10 }
 0x146   : > { %1217 = vrot.lane.b32.xlu1 %v1180_v10, %s1610_s10  ;;  %1359 = vrot.lane.b32.xlu0 %v1323_v51, %s1611_s11 }
 0x14a   : > { %1233 = vrot.lane.b32.xlu1 %v1188_v37, %s1610_s10  ;;  %1075 = vrot.lane.b32.xlu0 %v1037_v29, %s1609_s9 }
 0x14e   : > { %1077 = vrot.lane.b32.xlu1 %v1038_v44, %s1609_s9  ;;  %1091 = vrot.lane.b32.xlu0 %v1045_v58, %s1609_s9 }
 0x152   : > { %1093 = vrot.lane.b32.xlu1 %v1046_v23, %s1609_s9  ;;  %1219 = vrot.lane.b32.xlu0 %v1181_v62, %s1610_s10  ;;  %v970_v23 = vsel %vm922_vm1, %v2303_v45, 0.0 }
 0x156   : > { %1221 = vrot.lane.b32.xlu1 %v1182_v32, %s1610_s10  ;;  %1235 = vrot.lane.b32.xlu0 %v1189_v18, %s1610_s10 }
 0x15a   : > { %1237 = vrot.lane.b32.xlu1 %v1190_v61, %s1610_s10  ;;  %1363 = vrot.lane.b32.xlu0 %v1325_v54, %s1611_s11 }
 0x15e   : > { %1361 = vrot.lane.b32.xlu1 %v1324_v9, %s1611_s11  ;;  %1367 = vrot.lane.b32.xlu0 %v1327_v15, %s1611_s11 }
 0x162   : > { %1365 = vrot.lane.b32.xlu1 %v1326_v50, %s1611_s11  ;;  %1371 = vrot.lane.b32.xlu0 %v1329_v42, %s1611_s11  ;;  %v969_v42 = vsel %vm921_vm4, %v2330_v13, 0.0 }
 0x166   : > { %1369 = vrot.lane.b32.xlu1 %v1328_v6, %s1611_s11  ;;  %1375 = vrot.lane.b32.xlu0 %v1331_v34, %s1611_s11 }
 0x16a   : > { %1373 = vrot.lane.b32.xlu1 %v1330_v59, %s1611_s11  ;;  %1379 = vrot.lane.b32.xlu0 %v1333_v21, %s1611_s11 }
 0x16e   : > { %1377 = vrot.lane.b32.xlu1 %v1332_v41, %s1611_s11  ;;  %v971_v41 = vsel %vm923_vm7, %v2406_v2, 0.0 }
 0x172   : > { %1381 = vrot.lane.b32.xlu1 %v1334_v31, %s1611_s11 }
 0x178   : > { %v1066_v8 = vpop.permute.xlu1 %1065  ;;  %v1064_v27 = vpop.permute.xlu0 %1063 }
 0x179   : > { %v1112_v63 = vadd.f32 %v1066_v8, %v968_v5  ;;  %v1111_v52 = vadd.f32 %v1064_v27, %v967_v43 }
 0x188   : > { %v1082_v36 = vpop.permute.xlu1 %1081  ;;  %v1080_v25 = vpop.permute.xlu0 %1079 }
 0x189   : > { %v1120_v39 = vadd.f32 %v1082_v36, %v976_v11  ;;  %v2597_v16 = vadd.f32 %v1080_v25, %v975_v22 }
 0x18c   : > { %v1210_v7 = vpop.permute.xlu1 %1209  ;;  %v1208_v48 = vpop.permute.xlu0 %1207 }
 0x18d   : > { %v1256_v35 = vadd.f32 %v1210_v7, %v1112_v63  ;;  %v1255_v55 = vadd.f32 %v1208_v48, %v1111_v52  ;;  %v972_v63 = vsel %vm924_vm5, %v2372_v20, 0.0 }
 0x190   : > { %v1226_v56 = vpop.permute.xlu1 %1225  ;;  %v2603_v40 = vpop.permute.xlu0 %1223 }
 0x191   : > { %v2605_v33 = vadd.f32 %v1226_v56, %v1120_v39 }
 0x194   : > { %v1354_v47 = vpop.permute.xlu1 %1353  ;;  %v1352_v0 = vpop.permute.xlu0 %1351 }
 0x195   : > { %v1400_v19 = vadd.f32 %v1354_v47, %v1256_v35  ;;  %v1399_v38 = vadd.f32 %v1352_v0, %v1255_v55  ;;  %v1263_v0 = vadd.f32 %v2603_v40, %v2597_v16 }
 0x197   : > { %1416 = vst.msk [vmem:[%s2611_s14 + $0x8] sm:$0xff] %vm276_vm0, %v1400_v19  ;;  %1415 = vst.msk [vmem:[%s2611_s14] sm:$0xff] %vm276_vm0, %v1399_v38 }
 0x198   : > { %v1084_v10 = vpop.permute.xlu0 %1083  ;;  %v1070_v51 = vpop.permute.xlu1 %1069 }
 0x199   : > { %v1114_v18 = vadd.f32 %v1070_v51, %v970_v23  ;;  %v1121_v20 = vadd.f32 %v1084_v10, %v2461_v4 }
 0x19c   : > { %v2617_v37 = vpop.permute.xlu1 %1085  ;;  %v1212_v29 = vpop.permute.xlu0 %1211 }
 0x1a0   : > { %v1214_v44 = vpop.permute.xlu1 %1213  ;;  %v1228_v58 = vpop.permute.xlu0 %1227 }
 0x1a1   : > { %v1258_v61 = vadd.f32 %v1214_v44, %v1114_v18  ;;  %v1265_v23 = vadd.f32 %v1228_v58, %v1121_v20  ;;  %v978_v58 = vsel %vm930_vm2, %v2317_v60, 0.0  ;;  %v980_v60 = vsel %vm932_vm11, %v2397_v14, 0.0 }
 0x1a2   : > { %v1122_v49 = vadd.f32 %v2617_v37, %v978_v58 }
 0x1a4   : > { %v2621_v62 = vpop.permute.xlu1 %1229  ;;  %v1356_v32 = vpop.permute.xlu0 %1355 }
 0x1a8   : > { %v1358_v54 = vpop.permute.xlu1 %1357  ;;  %v1072_v9 = vpop.permute.xlu0 %1071 }
 0x1a9   : > { %v1402_v15 = vadd.f32 %v1358_v54, %v1258_v61  ;;  %v1115_v8 = vadd.f32 %v1072_v9, %v971_v41 }
 0x1ab   : > { %1418 = vst.msk [vmem:[%s2611_s14 + $0x18] sm:$0xff] %vm276_vm0, %v1402_v15  ;;  %v1266_v15 = vadd.f32 %v2621_v62, %v1122_v49 }
 0x1ac   : > { %v1068_v50 = vpop.permute.xlu1 %1067  ;;  %v1088_v6 = vpop.permute.xlu0 %1087 }
 0x1ad   : > { %v1113_v53 = vadd.f32 %v1068_v50, %v969_v42  ;;  %v1123_v57 = vadd.f32 %v1088_v6, %v2471_v26 }
 0x1af   : > { %v1257_v45 = vadd.f32 %v1212_v29, %v1113_v53 }
 0x1b0   : > { %v1074_v34 = vpop.permute.xlu1 %1073  ;;  %v1216_v59 = vpop.permute.xlu0 %1215 }
 0x1b1   : > { %v1401_v21 = vadd.f32 %v1356_v32, %v1257_v45  ;;  %v1259_v27 = vadd.f32 %v1216_v59, %v1115_v8  ;;  %v1116_v55 = vadd.f32 %v1074_v34, %v972_v63 }
 0x1b3   : > { %1417 = vst.msk [vmem:[%s2611_s14 + $0x10] sm:$0xff] %vm276_vm0, %v1401_v21 }
 0x1b4   : > { %v2631_v31 = vpop.permute.xlu1 %1089  ;;  %v1232_v46 = vpop.permute.xlu0 %1231 }
 0x1b5   : > { %v1267_v10 = vadd.f32 %v1232_v46, %v1123_v57  ;;  %v1124_v37 = vadd.f32 %v2631_v31, %v980_v60 }
 0x1b8   : > { %v1218_v11 = vpop.permute.xlu1 %1217  ;;  %v1360_v13 = vpop.permute.xlu0 %1359 }
 0x1b9   : > { %v1403_v36 = vadd.f32 %v1360_v13, %v1259_v27  ;;  %v1260_v19 = vadd.f32 %v1218_v11, %v1116_v55 }
 0x1bb   : > { %1419 = vst.msk [vmem:[%s2611_s14 + $0x20] sm:$0xff] %vm276_vm0, %v1403_v36 }
 0x1bc   : > { %v1234_v22 = vpop.permute.xlu1 %1233  ;;  %v1076_v25 = vpop.permute.xlu0 %1075 }
 0x1bd   : > { %v1117_v2 = vadd.f32 %v1076_v25, %v2479_v17  ;;  %v1268_v53 = vadd.f32 %v1234_v22, %v1124_v37 }
 0x1c0   : > { %v1078_v39 = vpop.permute.xlu1 %1077  ;;  %v1092_v7 = vpop.permute.xlu0 %1091 }
 0x1c1   : > { %v1118_v51 = vadd.f32 %v1078_v39, %v974_v28  ;;  %v1125_v26 = vadd.f32 %v1092_v7, %v2488_v3 }
 0x1c4   : > { %v1094_v30 = vpop.permute.xlu1 %1093  ;;  %v1220_v48 = vpop.permute.xlu0 %1219 }
 0x1c5   : > { %v1261_v56 = vadd.f32 %v1220_v48, %v1117_v2  ;;  %v1126_v62 = vadd.f32 %v1094_v30, %v2491_v24 }
 0x1c8   : > { %v1222_v5 = vpop.permute.xlu1 %1221  ;;  %v1236_v43 = vpop.permute.xlu0 %1235 }
 0x1c9   : > { %v1262_v12 = vadd.f32 %v1222_v5, %v1118_v51  ;;  %v1269_v50 = vadd.f32 %v1236_v43, %v1125_v26 }
 0x1cc   : > { %v1238_v52 = vpop.permute.xlu1 %1237  ;;  %v1364_v35 = vpop.permute.xlu0 %1363 }
 0x1cd   : > { %v1405_v47 = vadd.f32 %v1364_v35, %v1261_v56  ;;  %v1270_v34 = vadd.f32 %v1238_v52, %v1126_v62 }
 0x1cf   : > { %1421 = vst.msk [vmem:[%s2611_s14 + $0x30] sm:$0xff] %vm276_vm0, %v1405_v47 }
 0x1d0   : > { %v1362_v17 = vpop.permute.xlu1 %1361  ;;  %v1368_v38 = vpop.permute.xlu0 %1367 }
 0x1d1   : > { %v1404_v29 = vadd.f32 %v1362_v17, %v1260_v19  ;;  %v1407_v44 = vadd.f32 %v1368_v38, %v1263_v0 }
 0x1d3   : > { %1420 = vst.msk [vmem:[%s2611_s14 + $0x28] sm:$0xff] %vm276_vm0, %v1404_v29  ;;  %1423 = vst.msk [vmem:[%s2611_s14 + $0x40] sm:$0xff] %vm276_vm0, %v1407_v44 }
 0x1d4   : > { %v1366_v16 = vpop.permute.xlu1 %1365  ;;  %v1372_v40 = vpop.permute.xlu0 %1371 }
 0x1d5   : > { %v1406_v32 = vadd.f32 %v1366_v16, %v1262_v12  ;;  %v1409_v4 = vadd.f32 %v1372_v40, %v1265_v23 }
 0x1d7   : > { %1422 = vst.msk [vmem:[%s2611_s14 + $0x38] sm:$0xff] %vm276_vm0, %v1406_v32  ;;  %1425 = vst.msk [vmem:[%s2611_s14 + $0x50] sm:$0xff] %vm276_vm0, %v1409_v4 }
 0x1d8   : > { %v1370_v18 = vpop.permute.xlu1 %1369  ;;  %v1376_v61 = vpop.permute.xlu0 %1375 }
 0x1d9   : > { %v1408_v54 = vadd.f32 %v1370_v18, %v2605_v33  ;;  %v1411_v9 = vadd.f32 %v1376_v61, %v1267_v10 }
 0x1db   : > { %1424 = vst.msk [vmem:[%s2611_s14 + $0x48] sm:$0xff] %vm276_vm0, %v1408_v54  ;;  %1427 = vst.msk [vmem:[%s2611_s14 + $0x60] sm:$0xff] %vm276_vm0, %v1411_v9 }
 0x1dc   : > { %v1374_v1 = vpop.permute.xlu1 %1373  ;;  %v1380_v42 = vpop.permute.xlu0 %1379 }
 0x1dd   : > { %v1410_v6 = vadd.f32 %v1374_v1, %v1266_v15  ;;  %v1413_v3 = vadd.f32 %v1380_v42, %v1269_v50 }
 0x1df   : > { %1426 = vst.msk [vmem:[%s2611_s14 + $0x58] sm:$0xff] %vm276_vm0, %v1410_v6  ;;  %1429 = vst.msk [vmem:[%s2611_s14 + $0x70] sm:$0xff] %vm276_vm0, %v1413_v3 }
 0x1e0   : > { %v1378_v33 = vpop.permute.xlu1 %1377 }
 0x1e1   : > { %v1412_v45 = vadd.f32 %v1378_v33, %v1268_v53 }
 0x1e3   : > { %1428 = vst.msk [vmem:[%s2611_s14 + $0x68] sm:$0xff] %vm276_vm0, %v1412_v45 }
 0x1e4   : > { %v1382_v14 = vpop.permute.xlu1 %1381 }
 0x1e5   : > { %v1414_v59 = vadd.f32 %v1382_v14, %v1270_v34 }
 0x1e7   : > { %1430 = vst.msk [vmem:[%s2611_s14 + $0x78] sm:$0xff] %vm276_vm0, %v1414_v59 }
 0x1e8 PF: > { %s14_s15 = sadd.s32 1, %s1606_s15  }
 0x1e9   : > { %p11_p4 = scmp.ge.s32.totalorder %s14_s15, 4  }
 0x1eb   :  { %13 = sbr.rel (!%p11_p4) target bundleno = 1 (0x1), region = 69 }

</bundles_post_ra>
